<compile_context>
chip_gen: v5e
topology: v5e:2x2
jax: 0.10.0
libtpu: 0.0.40
codegen_flags: <defaults>
</compile_context>

<pallas_src>
import functools

import jax
import jax.numpy as jnp
from jax.experimental import pallas as pl
from jax.experimental.pallas import tpu as pltpu


LANES = 128          # lane width (point index, fast axis)
MAX_TILE_ROWS = 1024  # sublane rows per grid step -> 1024*128 = 131072 points
                      # per block: 1.5 MiB in + 0.5 MiB out (x2 double-buffer
                      # = 4 MiB), far below even v5e's 16 MiB scoped VMEM.


def _torus_sdf_kernel(center_ref, radii_ref, pts_ref, out_ref):
    # center_ref: SMEM (3,)   radii_ref: SMEM (2,)
    # pts_ref:    VMEM (3, TILE_ROWS, LANES)   out_ref: VMEM (TILE_ROWS, LANES)
    x = pts_ref[0] - center_ref[0]          # (TILE_ROWS, LANES), dense vregs
    y = pts_ref[1] - center_ref[1]
    z = pts_ref[2] - center_ref[2]

    # norm over the first two coordinates, minus major radius R
    ring = jnp.sqrt(x * x + y * y) - radii_ref[0]
    # norm of (ring, z), minus minor radius r
    out_ref[...] = jnp.sqrt(ring * ring + z * z) - radii_ref[1]


def _choose_tile_rows(rows):
    """Pick a sublane tile size: big for amortization, >=2 tiles when possible."""
    if rows <= 16:
        # tiny input: one block whose dims equal the full array dims (allowed).
        return rows
    # aim for at least 2 grid steps (megacore on v7x), 8-aligned, capped.
    tile = min(MAX_TILE_ROWS, -(-rows // 2))
    return -(-tile // 8) * 8


@functools.partial(jax.jit, static_argnames=())
def torus_sdf_forward(points, center, radii):
    """points: any shape (..., 3) float32. Returns (N, 1) float32, N = prod(leading dims)."""
    pts = points.reshape(-1, 3).astype(jnp.float32)      # (N, 3)
    n = pts.shape[0]

    rows = -(-n // LANES)                                 # ceil(N / 128)
    tile_rows = _choose_tile_rows(rows)
    num_tiles = -(-rows // tile_rows)
    rows_pad = num_tiles * tile_rows
    n_pad = rows_pad * LANES

    # single pad pass (padded tail stays finite: sqrt(0)-R then |.|-r, sliced off)
    pts_padded = jnp.pad(pts, ((0, n_pad - n), (0, 0)))   # (n_pad, 3)
    # one transpose pass; the trailing reshape is contiguous (free)
    pts_t = pts_padded.T.reshape(3, rows_pad, LANES)      # (3, rows_pad, 128)

    out = pl.pallas_call(
        _torus_sdf_kernel,
        out_shape=jax.ShapeDtypeStruct((rows_pad, LANES), jnp.float32),
        grid_spec=pltpu.PrefetchScalarGridSpec(
            num_scalar_prefetch=0,
            grid=(num_tiles,),
            in_specs=[
                pl.BlockSpec(memory_space=pltpu.MemorySpace.SMEM),   # center (3,)
                pl.BlockSpec(memory_space=pltpu.MemorySpace.SMEM),   # radii (2,)
                pl.BlockSpec((3, tile_rows, LANES), lambda i: (0, i, 0)),
            ],
            out_specs=pl.BlockSpec((tile_rows, LANES), lambda i: (i, 0)),
        ),
        compiler_params=pltpu.CompilerParams(
            dimension_semantics=("parallel",),
        ),
    )(center, radii, pts_t)

    return out.reshape(-1)[:n].reshape(n, 1)


def torus_sdf_reference(points, center, radii):
    pts = points.reshape(-1, 3).astype(jnp.float32)
    diff = pts - center[None, :]
    ring = jnp.linalg.norm(diff[:, :2], axis=-1) - radii[0]
    q = jnp.stack([ring, diff[:, 2]], axis=-1)
    return (jnp.linalg.norm(q, axis=-1) - radii[1])[:, None]


if __name__ == "__main__":
    # Deterministic parameters (module __init__ defaults).
    center = jnp.array([0.0, 0.0, 0.0], dtype=jnp.float32)   # (3,)
    radii = jnp.array([1.0, 0.25], dtype=jnp.float32)         # (2,)

    # Small deterministic input: batch=2, seq=128 points, 3 coords -> N = 256.
    key = jax.random.PRNGKey(0)
    points = jax.random.normal(key, (2, 128, 3), dtype=jnp.float32)

    out = torus_sdf_forward(points, center, radii)
    out = jax.block_until_ready(out)

    ref = torus_sdf_reference(points, center, radii)
    assert out.shape == (256, 1), out.shape
    assert jnp.allclose(out, ref, atol=1e-5, rtol=1e-5), float(jnp.max(jnp.abs(out - ref)))

    # Also exercise the multi-tile path with a larger, non-aligned point count.
    points_big = jax.random.normal(jax.random.PRNGKey(1), (5, 1111, 3), dtype=jnp.float32)
    out_big = jax.block_until_ready(torus_sdf_forward(points_big, center, radii))
    ref_big = torus_sdf_reference(points_big, center, radii)
    assert out_big.shape == (5 * 1111, 1), out_big.shape
    assert jnp.allclose(out_big, ref_big, atol=1e-5, rtol=1e-5), \
        float(jnp.max(jnp.abs(out_big - ref_big)))

    print("KERNEL_OK")
</pallas_src>

<mosaic_0001>
module attributes {stable_mosaic.version = 11 : i64} {
  func.func @_torus_sdf_kernel(%arg0: i32, %arg1: memref<3xf32, #tpu.memory_space<smem>>, %arg2: memref<2xf32, #tpu.memory_space<smem>>, %arg3: memref<3x2x128xf32, #tpu.memory_space<vmem>>, %arg4: memref<2x128xf32, #tpu.memory_space<vmem>>) attributes {dimension_semantics = [#tpu.dimension_semantics<parallel>], iteration_bounds = array<i64: 1>, scalar_prefetch = 0 : i64, scratch_operands = 0 : i64, tpu.core_type = #tpu.core_type<tc>, window_params = [{transform_indices = @transform_0, window_bounds = array<i64: 3>}, {transform_indices = @transform_1, window_bounds = array<i64: 2>}, {transform_indices = @transform_2, window_bounds = array<i64: 3, 2, 128>}, {transform_indices = @transform_3, window_bounds = array<i64: 2, 128>}]} {
    %c0 = arith.constant 0 : index
    %c0_0 = arith.constant 0 : index
    %c0_1 = arith.constant 0 : index
    %0 = vector.load %arg3[%c0, %c0_0, %c0_1] : memref<3x2x128xf32, #tpu.memory_space<vmem>>, vector<1x2x128xf32>
    %1 = vector.shape_cast %0 : vector<1x2x128xf32> to vector<2x128xf32>
    %c0_2 = arith.constant 0 : index
    %2 = memref.load %arg1[%c0_2] : memref<3xf32, #tpu.memory_space<smem>>
    %3 = vector.broadcast %2 : f32 to vector<2x128xf32>
    %4 = arith.subf %1, %3 : vector<2x128xf32>
    %c1 = arith.constant 1 : index
    %c0_3 = arith.constant 0 : index
    %c0_4 = arith.constant 0 : index
    %5 = vector.load %arg3[%c1, %c0_3, %c0_4] : memref<3x2x128xf32, #tpu.memory_space<vmem>>, vector<1x2x128xf32>
    %6 = vector.shape_cast %5 : vector<1x2x128xf32> to vector<2x128xf32>
    %c1_5 = arith.constant 1 : index
    %7 = memref.load %arg1[%c1_5] : memref<3xf32, #tpu.memory_space<smem>>
    %8 = vector.broadcast %7 : f32 to vector<2x128xf32>
    %9 = arith.subf %6, %8 : vector<2x128xf32>
    %c2 = arith.constant 2 : index
    %c0_6 = arith.constant 0 : index
    %c0_7 = arith.constant 0 : index
    %10 = vector.load %arg3[%c2, %c0_6, %c0_7] : memref<3x2x128xf32, #tpu.memory_space<vmem>>, vector<1x2x128xf32>
    %11 = vector.shape_cast %10 : vector<1x2x128xf32> to vector<2x128xf32>
    %c2_8 = arith.constant 2 : index
    %12 = memref.load %arg1[%c2_8] : memref<3xf32, #tpu.memory_space<smem>>
    %13 = vector.broadcast %12 : f32 to vector<2x128xf32>
    %14 = arith.subf %11, %13 : vector<2x128xf32>
    %15 = arith.mulf %4, %4 : vector<2x128xf32>
    %16 = arith.mulf %9, %9 : vector<2x128xf32>
    %17 = arith.addf %15, %16 : vector<2x128xf32>
    %18 = math.sqrt %17 : vector<2x128xf32>
    %c0_9 = arith.constant 0 : index
    %19 = memref.load %arg2[%c0_9] : memref<2xf32, #tpu.memory_space<smem>>
    %20 = vector.broadcast %19 : f32 to vector<2x128xf32>
    %21 = arith.subf %18, %20 : vector<2x128xf32>
    %22 = arith.mulf %21, %21 : vector<2x128xf32>
    %23 = arith.mulf %14, %14 : vector<2x128xf32>
    %24 = arith.addf %22, %23 : vector<2x128xf32>
    %25 = math.sqrt %24 : vector<2x128xf32>
    %c1_10 = arith.constant 1 : index
    %26 = memref.load %arg2[%c1_10] : memref<2xf32, #tpu.memory_space<smem>>
    %27 = vector.broadcast %26 : f32 to vector<2x128xf32>
    %28 = arith.subf %25, %27 : vector<2x128xf32>
    %c0_11 = arith.constant 0 : index
    %c0_12 = arith.constant 0 : index
    %29 = vector.load %arg4[%c0_11, %c0_12] : memref<2x128xf32, #tpu.memory_space<vmem>>, vector<2x128xf32>
    tpu.vector_store %arg4[%c0_11, %c0_12], %28 {strides = array<i32>} : memref<2x128xf32, #tpu.memory_space<vmem>>, vector<2x128xf32>,
    return
  }
  func.func @transform_0(%arg0: i32) -> i32 {
    %c0_i32 = arith.constant 0 : i32
    %c0_i32_0 = arith.constant 0 : i32
    return %c0_i32 : i32
  }
  func.func @transform_1(%arg0: i32) -> i32 {
    %c0_i32 = arith.constant 0 : i32
    %c0_i32_0 = arith.constant 0 : i32
    return %c0_i32 : i32
  }
  func.func @transform_2(%arg0: i32) -> (i32, i32, i32) {
    %c0_i32 = arith.constant 0 : i32
    %c0_i32_0 = arith.constant 0 : i32
    %c0_i32_1 = arith.constant 0 : i32
    return %c0_i32, %arg0, %c0_i32_0 : i32, i32, i32
  }
  func.func @transform_3(%arg0: i32) -> (i32, i32) {
    %c0_i32 = arith.constant 0 : i32
    %c0_i32_0 = arith.constant 0 : i32
    return %arg0, %c0_i32 : i32, i32
  }
}

</mosaic_0001>

<bundles_post_ra>
// kernel: torus_sdf_forward.1
= control target key start
LH: loop header
LB: loop body
LE: loop exit
PB: predicated region body
PF: predicated region fallthrough
CT: control target
= control target key end

     0   :  { %8 = vsyncpa [#allocation4], 0  ;;  %s216_s0 = inlined_call_operand.vmem [shape: f32[3], index: 0, kind: input, shape index: {}]   ;;  %s217_s1 = inlined_call_operand.vmem [shape: f32[2], index: 1, kind: input, shape index: {}]   ;;  %s218_s2 = inlined_call_operand.vmem [shape: f32[3,2,128], index: 2, kind: input, shape index: {}]   ;;  %s219_s3 = inlined_call_operand.hbm [shape: f32[2,128], index: 3, kind: output, shape index: {}]  }
   0x1   :  { %9 = vsyncpa [#allocation6], 0 }
   0x2   :  { %10 = vsyncpa [#allocation3], 0  ;;  %s16_s14 = sshll.u32 %s216_s0, 4  ;;  %s25_s17 = sshll.u32 %s217_s1, 4  ;;  %s17_s14 = int_to_ptr.vmem [resolvable:$true] %s16_s14  ;;  %s26_s17 = int_to_ptr.vmem [resolvable:$true] %s25_s17 }
   0x3   :  { %s175_s18 = smov [#allocation2]   ;;  %s176_s19 = smov [#allocation5]  }
   0x4   :  { %19 = dma.vmem_to_smem %s17_s14, 16, %s175_s18, [#allocation4]  }
   0x5   :  { %28 = dma.vmem_to_smem %s26_s17, 16, %s176_s19, [#allocation6]  }
   0x6   :  { %169 = dma.done.wait [#allocation4], 16  }
   0x7   :  { %170 = vsyncadd [#allocation4], 4294967280 }
   0x8   :  { %171 = dma.done.wait [#allocation6], 16  }
   0x9   :  { %172 = vsyncadd [#allocation6], 4294967280 }
   0xa   :  { %39 = sfence }
   0xb   :  { %s41_s20 = sld [smem:[#allocation2]]  ;;  %v40_v0 = vld [vmem:[%s218_s2] sm:$0x3]  ;;  %v109_v1 = vld [vmem:[%s218_s2 + $0x2] sm:$0x3]  ;;  %s98_s5 = sshll.u32 %s219_s3, 4  ;;  %s99_s5 = int_to_ptr.hbm [resolvable:$true] %s98_s5 }
   0xc   :  { %s110_s21 = sld [smem:[#allocation2 + $0x1]]  ;;  %v111_v14 = vld [vmem:[%s218_s2 + $0x4] sm:$0x3]  ;;  %s177_s2 = smov [#allocation7]  }
   0xd   :  { %s112_s1 = sld [smem:[#allocation2 + $0x2]]  ;;  %s96_s29 = sshll.u32 %s177_s2, 4  ;;  %s97_s29 = int_to_ptr.vmem [resolvable:$true] %s96_s29 }
   0xe   :  { %s69_s25 = sld [smem:[#allocation5]] }
   0xf   :  { %s113_s28 = sld [smem:[#allocation5 + $0x1]] }
  0x11   :  { %v42_v2 = vstv %s41_s20 }
  0x12   :  { %v43_v3 = vsub.f32 %v40_v0, %v42_v2  ;;  %v47_v4 = vstv %s110_s21 }
  0x13   :  { %v48_v5 = vsub.f32 %v109_v1, %v47_v4  ;;  %v52_v15 = vstv %s112_s1 }
  0x14   :  { %v54_v6 = vmul.f32 %v43_v3, %v43_v3  ;;  %v53_v18 = vsub.f32 %v111_v14, %v52_v15  ;;  %v70_v20 = vstv %s69_s25 }
  0x15   :  { %v55_v7 = vmul.f32 %v48_v5, %v48_v5  ;;  %v88_v35 = vstv %s113_s28 }
  0x16   :  { %v73_v24 = vmul.f32 %v53_v18, %v53_v18 }
  0x17   :  { %v56_v8 = vadd.f32 %v55_v7, %v54_v6 }
  0x19   :  { %117 = vrsqrt.f32 %v56_v8  ;;  %vm64_vm0 = vcmp.eq.f32.partialorder %v56_v8, inf  ;;  %v67_v17 = vand.u32 2147483648, %v56_v8  ;;  %vm66_vm1 = vcmp.eq.f32.partialorder %v56_v8, 0.0 }
  0x1f   :  { %v118_v9 = vpop.eup %117 }
  0x20   :  { %v58_v10 = vmul.f32 %v118_v9, %v56_v8 }
  0x22   :  { %v59_v11 = vmul.f32 %v118_v9, %v58_v10 }
  0x24   :  { %v60_v12 = vmul.f32 0.5, %v59_v11 }
  0x26   :  { %v61_v13 = vsub.f32 1.5, %v60_v12 }
  0x28   :  { %v62_v16 = vmul.f32 %v118_v9, %v61_v13 }
  0x2a   :  { %v63_v19 = vmul.f32 %v62_v16, %v56_v8 }
  0x2c   :  { %v65_v21 = vsel %vm64_vm0, %v56_v8, %v63_v19 }
  0x2d   :  { %v68_v22 = vsel %vm66_vm1, %v67_v17, %v65_v21 }
  0x2e   :  { %v71_v23 = vsub.f32 %v68_v22, %v70_v20 }
  0x30   :  { %v72_v25 = vmul.f32 %v71_v23, %v71_v23 }
  0x32   :  { %v74_v26 = vadd.f32 %v73_v24, %v72_v25 }
  0x34   :  { %119 = vrsqrt.f32 %v74_v26  ;;  %vm82_vm2 = vcmp.eq.f32.partialorder %v74_v26, inf  ;;  %v85_v33 = vand.u32 2147483648, %v74_v26  ;;  %vm84_vm3 = vcmp.eq.f32.partialorder %v74_v26, 0.0 }
  0x3a   :  { %v120_v27 = vpop.eup %119 }
  0x3b   :  { %v76_v28 = vmul.f32 %v120_v27, %v74_v26 }
  0x3d   :  { %v77_v29 = vmul.f32 %v120_v27, %v76_v28 }
  0x3f   :  { %v78_v30 = vmul.f32 0.5, %v77_v29 }
  0x41   :  { %v79_v31 = vsub.f32 1.5, %v78_v30 }
  0x43   :  { %v80_v32 = vmul.f32 %v120_v27, %v79_v31 }
  0x45   :  { %v81_v34 = vmul.f32 %v80_v32, %v74_v26 }
  0x47   :  { %v83_v36 = vsel %vm82_vm2, %v74_v26, %v81_v34 }
  0x48   :  { %v86_v37 = vsel %vm84_vm3, %v85_v33, %v83_v36 }
  0x49   :  { %v89_v38 = vsub.f32 %v86_v37, %v88_v35 }
  0x4b   :  { %90 = vst [vmem:[#allocation7] sm:$0x3] %v89_v38 }
  0x4c   :  { %101 = dma.vmem_to_hbm [thread:$0]  %s97_s29, 32, %s99_s5, [#allocation3]  }
  0x4d   :  { %173 = dma.done.wait [#allocation3], 32  }
  0x4e   :  { %174 = vsyncadd [#allocation3], 4294967264 }
  0x4f   :  { %106 = vsyncpa [#allocation3], 1 }
  0x50   :  { %107 = vsyncpa [#allocation4], 1 }
  0x51   :  { %108 = vsyncpa [#allocation6], 1 }

</bundles_post_ra>
